<compile_context>
chip_gen: v5e
topology: v5e:2x2
jax: 0.10.0
libtpu: 0.0.40
codegen_flags: <defaults>
</compile_context>

<pallas_src>
import functools

import jax
import jax.numpy as jnp
from jax.experimental import pallas as pl

BN_EPS = 1e-5


# ----------------------------- Pallas kernel --------------------------------

def _fused_conv_bn_relu_kernel(x_ref, w_ref, g_ref, gamma_ref, beta_ref, o_ref,
                               *, n, oh, ow, kh, stride, dilation):
    """Fused conv (KH block-Toeplitz matmuls) + train-mode BN + ReLU.

    x_ref:     (N, HP, WP*C_in)         padded NHWC input, (W, C_in) on lanes
    w_ref:     (KH, WP*C_in, OW*C_out)  block-Toeplitz weights (bias cancels under
                                        batch-stat BN, so it is omitted)
    g_ref:     (OW*C_out, OW*C_out)     per-channel group indicator (l1%C == l2%C)
    gamma_ref: (1, OW*C_out)            BN gamma tiled over the OW lane groups
    beta_ref:  (1, OW*C_out)            BN beta tiled over the OW lane groups
    o_ref:     (N*OH, OW*C_out)         lane-dense output
    """
    # ---- convolution: accumulate KH row-slab matmuls per image (f32 on MXU) ----
    for img in range(n):
        acc = None
        for i in range(kh):
            row0 = i * dilation
            if stride == 1:
                slab = x_ref[img, pl.ds(row0, oh), :]          # (OH, WP*C_in)
            else:
                slab = x_ref[img, pl.ds(row0, oh, stride), :]  # strided rows
            part = jnp.dot(slab, w_ref[i], preferred_element_type=jnp.float32)
            acc = part if acc is None else acc + part
        o_ref[pl.ds(img * oh, oh), :] = acc                    # stage conv result in VMEM

    # ---- BatchNorm (batch stats, biased var) + ReLU, all while y is resident ----
    y = o_ref[...]                                             # (N*OH, OW*C_out)
    inv_m = 1.0 / float(n * oh * ow)
    col_sum = jnp.sum(y, axis=0, keepdims=True)                # (1, OW*C_out)
    col_sq = jnp.sum(y * y, axis=0, keepdims=True)             # one pass over y
    # Reduce over the OW lane groups and broadcast back per channel, on the MXU.
    ch_sum = jnp.dot(col_sum, g_ref[...], preferred_element_type=jnp.float32)
    ch_sq = jnp.dot(col_sq, g_ref[...], preferred_element_type=jnp.float32)
    mean = ch_sum * inv_m
    var = ch_sq * inv_m - mean * mean                          # E[y^2] - E[y]^2
    scale = jax.lax.rsqrt(var + BN_EPS) * gamma_ref[...]
    shift = beta_ref[...] - mean * scale
    o_ref[...] = jnp.maximum(y * scale + shift, 0.0)


# ------------------------------ JAX wrapper ----------------------------------

@functools.partial(jax.jit, static_argnames=("stride", "padding", "dilation"))
def conv_block_forward(x, conv_b_unused, conv_w, bn_gamma, bn_beta,
                       stride=1, padding=1, dilation=1):
    # (signature reordered internally below for clarity)
    raise NotImplementedError  # placeholder, real entry point is below


@functools.partial(jax.jit, static_argnames=("stride", "padding", "dilation"))
def conv_block(x, conv_w, conv_b, bn_gamma, bn_beta,
               stride=1, padding=1, dilation=1):
    """ConvBlock.forward on a fresh (train-mode) module.

    x: (N, C_in, H, W) NCHW float32; conv_w: (C_out, C_in, KH, KW); conv_b: (C_out,)
    bn_gamma, bn_beta: (C_out,).  Returns (N, C_out, OH, OW) NCHW.

    conv_b is accepted for interface parity but not used: a per-channel constant
    is exactly cancelled by the batch-mean subtraction of train-mode BatchNorm.
    """
    del conv_b
    n, c_in, h, w = x.shape
    c_out, _, kh, kw = conv_w.shape
    oh = (h + 2 * padding - dilation * (kh - 1) - 1) // stride + 1
    ow = (w + 2 * padding - dilation * (kw - 1) - 1) // stride + 1
    hp, wp = h + 2 * padding, w + 2 * padding
    owc = ow * c_out

    # --- light XLA-side layout prep (no im2col copy) ---
    x_nhwc = jnp.transpose(x, (0, 2, 3, 1)).astype(jnp.float32)
    xp = jnp.pad(x_nhwc, ((0, 0), (padding, padding), (padding, padding), (0, 0)))
    x2 = xp.reshape(n, hp, wp * c_in)                      # (W, C_in) flattened onto lanes

    # Block-Toeplitz weights: w_t[i, w*C_in+ci, o*C_out+co] = conv_w[co, ci, i, j]
    # whenever w == o*stride + j*dilation (horizontal taps / stride / dilation absorbed).
    w_k = jnp.transpose(conv_w, (2, 3, 1, 0)).astype(jnp.float32)   # (KH, KW, C_in, C_out)
    sel = (jnp.arange(wp)[:, None, None]
           == jnp.arange(ow)[None, :, None] * stride
           + jnp.arange(kw)[None, None, :] * dilation)              # (WP, OW, KW)
    w_t = jnp.einsum("woj,ijcd->iwcod", sel.astype(jnp.float32), w_k)
    w_t = w_t.reshape(kh, wp * c_in, owc)

    # Per-channel group indicator: lane l carries channel (l % C_out).
    lane = jnp.arange(owc)
    gmat = (lane[:, None] % c_out == lane[None, :] % c_out).astype(jnp.float32)

    gamma_t = jnp.tile(bn_gamma.astype(jnp.float32), ow).reshape(1, owc)
    beta_t = jnp.tile(bn_beta.astype(jnp.float32), ow).reshape(1, owc)

    kernel = functools.partial(
        _fused_conv_bn_relu_kernel,
        n=n, oh=oh, ow=ow, kh=kh, stride=stride, dilation=dilation)

    out2 = pl.pallas_call(
        kernel,
        out_shape=jax.ShapeDtypeStruct((n * oh, owc), jnp.float32),
        in_specs=[
            pl.BlockSpec((n, hp, wp * c_in), lambda: (0, 0, 0)),
            pl.BlockSpec((kh, wp * c_in, owc), lambda: (0, 0, 0)),
            pl.BlockSpec((owc, owc), lambda: (0, 0)),
            pl.BlockSpec((1, owc), lambda: (0, 0)),
            pl.BlockSpec((1, owc), lambda: (0, 0)),
        ],
        out_specs=pl.BlockSpec((n * oh, owc), lambda: (0, 0)),
        # Whole problem (~10 KB input, ~100 KB weights, 16 KB output) fits VMEM on
        # v5e/v6e/v7x; a single grid step avoids per-step pipeline overhead.
        # TODO(synk): for large N*OH, add a "parallel" grid axis over images so the
        # work can shard across v7x's two TensorCores / stay under 64 MiB VMEM.
    )(x2, w_t, gmat, gamma_t, beta_t)

    # (N*OH, OW*C_out) -> NCHW (kept only for PyTorch interface parity; an NHWC
    # consumer could skip this transpose).
    return out2.reshape(n, oh, ow, c_out).transpose(0, 3, 1, 2)


# ------------------------------ reference -----------------------------------

def _reference(x, conv_w, conv_b, bn_gamma, bn_beta, stride, padding, dilation):
    y = jax.lax.conv_general_dilated(
        x, conv_w,
        window_strides=(stride, stride),
        padding=[(padding, padding), (padding, padding)],
        rhs_dilation=(dilation, dilation),
        dimension_numbers=("NCHW", "OIHW", "NCHW"),
    ) + conv_b[None, :, None, None]
    mean = jnp.mean(y, axis=(0, 2, 3), keepdims=True)
    var = jnp.mean((y - mean) ** 2, axis=(0, 2, 3), keepdims=True)
    y = (y - mean) * jax.lax.rsqrt(var + BN_EPS)
    y = y * bn_gamma[None, :, None, None] + bn_beta[None, :, None, None]
    return jnp.maximum(y, 0.0)


# --------------------------------- main --------------------------------------

if __name__ == "__main__":
    # ConvBlock(in_channel=4, out_channel=8, kernel_size=3, stride=1, padding=1)
    N, C_IN, H, W = 2, 4, 16, 16
    C_OUT, KH, KW = 8, 3, 3
    STRIDE, PADDING, DILATION = 1, 1, 1

    key = jax.random.PRNGKey(0)
    kx, kw_, kb, kg, kbt = jax.random.split(key, 5)

    x = jax.random.normal(kx, (N, C_IN, H, W), dtype=jnp.float32)
    conv_w = 0.1 * jax.random.normal(kw_, (C_OUT, C_IN, KH, KW), dtype=jnp.float32)
    conv_b = 0.1 * jax.random.normal(kb, (C_OUT,), dtype=jnp.float32)
    bn_gamma = 1.0 + 0.1 * jax.random.normal(kg, (C_OUT,), dtype=jnp.float32)
    bn_beta = 0.1 * jax.random.normal(kbt, (C_OUT,), dtype=jnp.float32)

    out = conv_block(x, conv_w, conv_b, bn_gamma, bn_beta,
                     stride=STRIDE, padding=PADDING, dilation=DILATION)
    out = jax.block_until_ready(out)

    ref = _reference(x, conv_w, conv_b, bn_gamma, bn_beta,
                     STRIDE, PADDING, DILATION)
    assert out.shape == (N, C_OUT, H, W), out.shape
    assert jnp.allclose(out, ref, atol=1e-4, rtol=1e-4), (
        float(jnp.max(jnp.abs(out - ref))))

    print("KERNEL_OK")
</pallas_src>

<mosaic_0001>
module attributes {stable_mosaic.version = 11 : i64} {
  func.func @_fused_conv_bn_relu_kernel(%arg0: memref<2x18x72xf32, #tpu.memory_space<vmem>>, %arg1: memref<3x72x128xf32, #tpu.memory_space<vmem>>, %arg2: memref<128x128xf32, #tpu.memory_space<vmem>>, %arg3: memref<1x128xf32, #tpu.memory_space<vmem>>, %arg4: memref<1x128xf32, #tpu.memory_space<vmem>>, %arg5: memref<32x128xf32, #tpu.memory_space<vmem>>) attributes {dimension_semantics = [], scalar_prefetch = 0 : i64, scratch_operands = 0 : i64, tpu.core_type = #tpu.core_type<tc>} {
    %c0 = arith.constant 0 : index
    %c0_0 = arith.constant 0 : index
    %c0_1 = arith.constant 0 : index
    %0 = vector.load %arg0[%c0, %c0_0, %c0_1] : memref<2x18x72xf32, #tpu.memory_space<vmem>>, vector<1x16x72xf32>
    %1 = vector.shape_cast %0 : vector<1x16x72xf32> to vector<16x72xf32>
    %c0_2 = arith.constant 0 : index
    %c0_3 = arith.constant 0 : index
    %c0_4 = arith.constant 0 : index
    %2 = vector.load %arg1[%c0_2, %c0_3, %c0_4] : memref<3x72x128xf32, #tpu.memory_space<vmem>>, vector<1x72x128xf32>
    %3 = vector.shape_cast %2 : vector<1x72x128xf32> to vector<72x128xf32>
    %cst = arith.constant dense<0.000000e+00> : vector<16x128xf32>
    %4 = tpu.matmul %1, %3, %cst {dimension_numbers = #tpu.dot_dimension_numbers<[1], [0], [0], [1], [0, 0, 1, 1], [], []>} : vector<16x72xf32>, vector<72x128xf32>, vector<16x128xf32> -> vector<16x128xf32>
    %c0_5 = arith.constant 0 : index
    %c1 = arith.constant 1 : index
    %c0_6 = arith.constant 0 : index
    %5 = vector.load %arg0[%c0_5, %c1, %c0_6] : memref<2x18x72xf32, #tpu.memory_space<vmem>>, vector<1x16x72xf32>
    %6 = vector.shape_cast %5 : vector<1x16x72xf32> to vector<16x72xf32>
    %c1_7 = arith.constant 1 : index
    %c0_8 = arith.constant 0 : index
    %c0_9 = arith.constant 0 : index
    %7 = vector.load %arg1[%c1_7, %c0_8, %c0_9] : memref<3x72x128xf32, #tpu.memory_space<vmem>>, vector<1x72x128xf32>
    %8 = vector.shape_cast %7 : vector<1x72x128xf32> to vector<72x128xf32>
    %cst_10 = arith.constant dense<0.000000e+00> : vector<16x128xf32>
    %9 = tpu.matmul %6, %8, %cst_10 {dimension_numbers = #tpu.dot_dimension_numbers<[1], [0], [0], [1], [0, 0, 1, 1], [], []>} : vector<16x72xf32>, vector<72x128xf32>, vector<16x128xf32> -> vector<16x128xf32>
    %10 = arith.addf %4, %9 : vector<16x128xf32>
    %c0_11 = arith.constant 0 : index
    %c2 = arith.constant 2 : index
    %c0_12 = arith.constant 0 : index
    %11 = vector.load %arg0[%c0_11, %c2, %c0_12] : memref<2x18x72xf32, #tpu.memory_space<vmem>>, vector<1x16x72xf32>
    %12 = vector.shape_cast %11 : vector<1x16x72xf32> to vector<16x72xf32>
    %c2_13 = arith.constant 2 : index
    %c0_14 = arith.constant 0 : index
    %c0_15 = arith.constant 0 : index
    %13 = vector.load %arg1[%c2_13, %c0_14, %c0_15] : memref<3x72x128xf32, #tpu.memory_space<vmem>>, vector<1x72x128xf32>
    %14 = vector.shape_cast %13 : vector<1x72x128xf32> to vector<72x128xf32>
    %cst_16 = arith.constant dense<0.000000e+00> : vector<16x128xf32>
    %15 = tpu.matmul %12, %14, %cst_16 {dimension_numbers = #tpu.dot_dimension_numbers<[1], [0], [0], [1], [0, 0, 1, 1], [], []>} : vector<16x72xf32>, vector<72x128xf32>, vector<16x128xf32> -> vector<16x128xf32>
    %16 = arith.addf %10, %15 : vector<16x128xf32>
    %c0_17 = arith.constant 0 : index
    %c0_18 = arith.constant 0 : index
    %17 = vector.load %arg5[%c0_17, %c0_18] : memref<32x128xf32, #tpu.memory_space<vmem>>, vector<16x128xf32>
    tpu.vector_store %arg5[%c0_17, %c0_18], %16 {strides = array<i32>} : memref<32x128xf32, #tpu.memory_space<vmem>>, vector<16x128xf32>,
    %c1_19 = arith.constant 1 : index
    %c0_20 = arith.constant 0 : index
    %c0_21 = arith.constant 0 : index
    %18 = vector.load %arg0[%c1_19, %c0_20, %c0_21] : memref<2x18x72xf32, #tpu.memory_space<vmem>>, vector<1x16x72xf32>
    %19 = vector.shape_cast %18 : vector<1x16x72xf32> to vector<16x72xf32>
    %c0_22 = arith.constant 0 : index
    %c0_23 = arith.constant 0 : index
    %c0_24 = arith.constant 0 : index
    %20 = vector.load %arg1[%c0_22, %c0_23, %c0_24] : memref<3x72x128xf32, #tpu.memory_space<vmem>>, vector<1x72x128xf32>
    %21 = vector.shape_cast %20 : vector<1x72x128xf32> to vector<72x128xf32>
    %cst_25 = arith.constant dense<0.000000e+00> : vector<16x128xf32>
    %22 = tpu.matmul %19, %21, %cst_25 {dimension_numbers = #tpu.dot_dimension_numbers<[1], [0], [0], [1], [0, 0, 1, 1], [], []>} : vector<16x72xf32>, vector<72x128xf32>, vector<16x128xf32> -> vector<16x128xf32>
    %c1_26 = arith.constant 1 : index
    %c1_27 = arith.constant 1 : index
    %c0_28 = arith.constant 0 : index
    %23 = vector.load %arg0[%c1_26, %c1_27, %c0_28] : memref<2x18x72xf32, #tpu.memory_space<vmem>>, vector<1x16x72xf32>
    %24 = vector.shape_cast %23 : vector<1x16x72xf32> to vector<16x72xf32>
    %c1_29 = arith.constant 1 : index
    %c0_30 = arith.constant 0 : index
    %c0_31 = arith.constant 0 : index
    %25 = vector.load %arg1[%c1_29, %c0_30, %c0_31] : memref<3x72x128xf32, #tpu.memory_space<vmem>>, vector<1x72x128xf32>
    %26 = vector.shape_cast %25 : vector<1x72x128xf32> to vector<72x128xf32>
    %cst_32 = arith.constant dense<0.000000e+00> : vector<16x128xf32>
    %27 = tpu.matmul %24, %26, %cst_32 {dimension_numbers = #tpu.dot_dimension_numbers<[1], [0], [0], [1], [0, 0, 1, 1], [], []>} : vector<16x72xf32>, vector<72x128xf32>, vector<16x128xf32> -> vector<16x128xf32>
    %28 = arith.addf %22, %27 : vector<16x128xf32>
    %c1_33 = arith.constant 1 : index
    %c2_34 = arith.constant 2 : index
    %c0_35 = arith.constant 0 : index
    %29 = vector.load %arg0[%c1_33, %c2_34, %c0_35] : memref<2x18x72xf32, #tpu.memory_space<vmem>>, vector<1x16x72xf32>
    %30 = vector.shape_cast %29 : vector<1x16x72xf32> to vector<16x72xf32>
    %c2_36 = arith.constant 2 : index
    %c0_37 = arith.constant 0 : index
    %c0_38 = arith.constant 0 : index
    %31 = vector.load %arg1[%c2_36, %c0_37, %c0_38] : memref<3x72x128xf32, #tpu.memory_space<vmem>>, vector<1x72x128xf32>
    %32 = vector.shape_cast %31 : vector<1x72x128xf32> to vector<72x128xf32>
    %cst_39 = arith.constant dense<0.000000e+00> : vector<16x128xf32>
    %33 = tpu.matmul %30, %32, %cst_39 {dimension_numbers = #tpu.dot_dimension_numbers<[1], [0], [0], [1], [0, 0, 1, 1], [], []>} : vector<16x72xf32>, vector<72x128xf32>, vector<16x128xf32> -> vector<16x128xf32>
    %34 = arith.addf %28, %33 : vector<16x128xf32>
    %c16 = arith.constant 16 : index
    %c0_40 = arith.constant 0 : index
    %35 = vector.load %arg5[%c16, %c0_40] : memref<32x128xf32, #tpu.memory_space<vmem>>, vector<16x128xf32>
    tpu.vector_store %arg5[%c16, %c0_40], %34 {strides = array<i32>} : memref<32x128xf32, #tpu.memory_space<vmem>>, vector<16x128xf32>,
    %c0_41 = arith.constant 0 : index
    %c0_42 = arith.constant 0 : index
    %36 = vector.load %arg5[%c0_41, %c0_42] : memref<32x128xf32, #tpu.memory_space<vmem>>, vector<32x128xf32>
    %cst_43 = arith.constant dense<0.000000e+00> : vector<128xf32>
    %37 = vector.multi_reduction <add>, %36, %cst_43 [0] : vector<32x128xf32> to vector<128xf32>
    %38 = vector.shape_cast %37 : vector<128xf32> to vector<1x128xf32>
    %39 = arith.mulf %36, %36 : vector<32x128xf32>
    %cst_44 = arith.constant dense<0.000000e+00> : vector<128xf32>
    %40 = vector.multi_reduction <add>, %39, %cst_44 [0] : vector<32x128xf32> to vector<128xf32>
    %41 = vector.shape_cast %40 : vector<128xf32> to vector<1x128xf32>
    %c0_45 = arith.constant 0 : index
    %c0_46 = arith.constant 0 : index
    %42 = vector.load %arg2[%c0_45, %c0_46] : memref<128x128xf32, #tpu.memory_space<vmem>>, vector<128x128xf32>
    %cst_47 = arith.constant dense<0.000000e+00> : vector<1x128xf32>
    %43 = tpu.matmul %38, %42, %cst_47 {dimension_numbers = #tpu.dot_dimension_numbers<[1], [0], [0], [1], [0, 0, 1, 1], [], []>} : vector<1x128xf32>, vector<128x128xf32>, vector<1x128xf32> -> vector<1x128xf32>
    %c0_48 = arith.constant 0 : index
    %c0_49 = arith.constant 0 : index
    %44 = vector.load %arg2[%c0_48, %c0_49] : memref<128x128xf32, #tpu.memory_space<vmem>>, vector<128x128xf32>
    %cst_50 = arith.constant dense<0.000000e+00> : vector<1x128xf32>
    %45 = tpu.matmul %41, %44, %cst_50 {dimension_numbers = #tpu.dot_dimension_numbers<[1], [0], [0], [1], [0, 0, 1, 1], [], []>} : vector<1x128xf32>, vector<128x128xf32>, vector<1x128xf32> -> vector<1x128xf32>
    %cst_51 = arith.constant 0.001953125 : f32
    %46 = vector.broadcast %cst_51 : f32 to vector<1x128xf32>
    %47 = arith.mulf %43, %46 : vector<1x128xf32>
    %cst_52 = arith.constant 0.001953125 : f32
    %48 = vector.broadcast %cst_52 : f32 to vector<1x128xf32>
    %49 = arith.mulf %45, %48 : vector<1x128xf32>
    %50 = arith.mulf %47, %47 : vector<1x128xf32>
    %51 = arith.subf %49, %50 : vector<1x128xf32>
    %cst_53 = arith.constant 9.99999974E-6 : f32
    %52 = vector.broadcast %cst_53 : f32 to vector<1x128xf32>
    %53 = arith.addf %51, %52 : vector<1x128xf32>
    %54 = math.rsqrt %53 : vector<1x128xf32>
    %c0_54 = arith.constant 0 : index
    %c0_55 = arith.constant 0 : index
    %55 = vector.load %arg3[%c0_54, %c0_55] : memref<1x128xf32, #tpu.memory_space<vmem>>, vector<1x128xf32>
    %56 = arith.mulf %54, %55 : vector<1x128xf32>
    %c0_56 = arith.constant 0 : index
    %c0_57 = arith.constant 0 : index
    %57 = vector.load %arg4[%c0_56, %c0_57] : memref<1x128xf32, #tpu.memory_space<vmem>>, vector<1x128xf32>
    %58 = arith.mulf %47, %56 : vector<1x128xf32>
    %59 = arith.subf %57, %58 : vector<1x128xf32>
    %60 = vector.broadcast %56 : vector<1x128xf32> to vector<32x128xf32>
    %61 = arith.mulf %36, %60 : vector<32x128xf32>
    %62 = vector.broadcast %59 : vector<1x128xf32> to vector<32x128xf32>
    %63 = arith.addf %61, %62 : vector<32x128xf32>
    %cst_58 = arith.constant 0.000000e+00 : f32
    %64 = vector.broadcast %cst_58 : f32 to vector<32x128xf32>
    %65 = arith.maximumf %63, %64 : vector<32x128xf32>
    %c0_59 = arith.constant 0 : index
    %c0_60 = arith.constant 0 : index
    %66 = vector.load %arg5[%c0_59, %c0_60] : memref<32x128xf32, #tpu.memory_space<vmem>>, vector<32x128xf32>
    tpu.vector_store %arg5[%c0_59, %c0_60], %65 {strides = array<i32>} : memref<32x128xf32, #tpu.memory_space<vmem>>, vector<32x128xf32>,
    return
  }
}

</mosaic_0001>

<bundles_post_ra>
// kernel: tile.13
= control target key start
LH: loop header
LB: loop body
LE: loop exit
PB: predicated region body
PF: predicated region fallthrough
CT: control target
= control target key end

     0   :  { %s28_s0 = inlined_call_operand.vmem [shape: f32[8], index: 0, kind: input, shape index: {}]   ;;  %s29_s1 = inlined_call_operand.vmem [shape: f32[16,8], index: 1, kind: output, shape index: {}]  }
   0x1   :  { %v4_v0 = vld [vmem:[%s28_s0] ss:$0 sm:$0xff] }
   0x2   :  { %5 = vst [vmem:[%s29_s1] sm:$0xff] %v4_v0 }
   0x3   :  { %8 = vst [vmem:[%s29_s1 + $0x8] sm:$0xff] %v4_v0 }

// kernel: tile.14
= control target key start
LH: loop header
LB: loop body
LE: loop exit
PB: predicated region body
PF: predicated region fallthrough
CT: control target
= control target key end

     0   :  { %s131_s10 = smov 120   ;;  %s132_s11 = smov 104   ;;  %vm3_vm0 = vcmask 64512   ;;  %vm9_vm1 = vcmask 1048512   ;;  %vm15_vm2 = vcmask 982912   ;;  %vm21_vm3 = vcmask 917312   ;;  %s207_s0 = inlined_call_operand.vmem [shape: f32[16,8], index: 0, kind: input, shape index: {}]   ;;  %s208_s1 = inlined_call_operand.vmem [shape: f32[1,128], index: 1, kind: output, shape index: {}]  }
   0x1   :  { %v101_v0 = vld [vmem:[%s207_s0 + $0xf] sm:$0x1]   ;;  %v103_v1 = vld [vmem:[%s207_s0 + $0xd] sm:$0x1]   ;;  %v105_v2 = vld [vmem:[%s207_s0 + $0xb] sm:$0x1]  }
   0x2   :  { %7 = vrot.lane.b32.xlu0 %v101_v0, %s131_s10  ;;  %19 = vrot.lane.b32.xlu1 %v103_v1, %s132_s11  ;;  %s133_s14 = smov 88   ;;  %v102_v3 = vld [vmem:[%s207_s0 + $0xe] sm:$0x1]   ;;  %v104_v4 = vld [vmem:[%s207_s0 + $0xc] sm:$0x1]   ;;  %s134_s19 = smov 112  }
   0x3   :  { %31 = vrot.lane.b32.xlu2 %v105_v2, %s133_s14  ;;  %s135_s20 = smov 96   ;;  %v106_v5 = vld [vmem:[%s207_s0 + $0xa] sm:$0x1]   ;;  %s136_s23 = smov 80   ;;  %v107_v6 = vld [vmem:[%s207_s0 + $0x9] sm:$0x1]  }
   0x4   :  { %v108_v7 = vld [vmem:[%s207_s0 + $0x8] sm:$0x1]   ;;  %s137_s28 = smov 72   ;;  %s138_s29 = smov 64   ;;  %v109_v8 = vld [vmem:[%s207_s0 + $0x7] sm:$0x1]  }
   0x5   :  { %s139_s3 = smov 56   ;;  %v110_v9 = vld [vmem:[%s207_s0 + $0x6] sm:$0x1]   ;;  %v111_v10 = vld [vmem:[%s207_s0 + $0x5] sm:$0x1]   ;;  %s140_s8 = smov 48  }
   0x6   :  { %s141_s9 = smov 40   ;;  %v112_v11 = vld [vmem:[%s207_s0 + $0x4] sm:$0x1]   ;;  %s142_s12 = smov 32   ;;  %v113_v12 = vld [vmem:[%s207_s0 + $0x3] sm:$0x1]  }
   0x7   :  { %v114_v13 = vld [vmem:[%s207_s0 + $0x2] sm:$0x1]   ;;  %s143_s17 = smov 24   ;;  %s144_s18 = smov 16   ;;  %v115_v14 = vld [vmem:[%s207_s0 + $0x1] sm:$0x1]  }
   0x8   :  { %s145_s21 = smov 8   ;;  %v2_v15 = vld [vmem:[%s207_s0] sm:$0x1]   ;;  %vm27_vm4 = vcmask 851712   ;;  %vm33_vm5 = vcmask 786112   ;;  %vm39_vm6 = vcmask 720512  }
   0x9   :  { %4 = vst.msk [vmem:[#allocation0] sm:$0x1] %vm3_vm0, %v2_v15   ;;  %vm45_vm7 = vcmask 654912   ;;  %vm51_vm8 = vcmask 589312   ;;  %vm57_vm9 = vcmask 523712   ;;  %vm63_vm10 = vcmask 458112  }
   0xa   :  { %13 = vrot.lane.b32.xlu0 %v102_v3, %s134_s19  ;;  %25 = vrot.lane.b32.xlu1 %v104_v4, %s135_s20  ;;  %vm69_vm11 = vcmask 392512   ;;  %vm75_vm12 = vcmask 326912   ;;  %vm81_vm13 = vcmask 261312   ;;  %vm87_vm14 = vcmask 195712  }
   0xb   :  { %37 = vrot.lane.b32.xlu2 %v106_v5, %s136_s23  ;;  %vm93_vm15 = vcmask 130112  }
  0x12   :  { %43 = vrot.lane.b32.xlu0 %v107_v6, %s137_s28  ;;  %49 = vrot.lane.b32.xlu1 %v108_v7, %s138_s29 }
  0x13   :  { %55 = vrot.lane.b32.xlu2 %v109_v8, %s139_s3 }
  0x1a   :  { %61 = vrot.lane.b32.xlu0 %v110_v9, %s140_s8  ;;  %67 = vrot.lane.b32.xlu1 %v111_v10, %s141_s9 }
  0x1b   :  { %73 = vrot.lane.b32.xlu2 %v112_v11, %s142_s12 }
  0x22   :  { %79 = vrot.lane.b32.xlu0 %v113_v12, %s143_s17  ;;  %85 = vrot.lane.b32.xlu1 %v114_v13, %s144_s18 }
  0x23   :  { %91 = vrot.lane.b32.xlu2 %v115_v14, %s145_s21 }
  0x5d   :  { %v32_v16 = vpop.permute.xlu2 %31  }
  0x65   :  { %v38_v17 = vpop.permute.xlu2 %37  }
  0x6d   :  { %v56_v18 = vpop.permute.xlu2 %55  }
  0x74   :  { %v8_v19 = vpop.permute.xlu0 %7   ;;  %v20_v20 = vpop.permute.xlu1 %19  }
  0x75   :  { %10 = vst.msk [vmem:[#allocation0] sm:$0x1] %vm9_vm1, %v8_v19   ;;  %v74_v21 = vpop.permute.xlu2 %73  }
  0x7c   :  { %v14_v22 = vpop.permute.xlu0 %13   ;;  %v26_v23 = vpop.permute.xlu1 %25  }
  0x7d   :  { %16 = vst.msk [vmem:[#allocation0] sm:$0x1] %vm15_vm2, %v14_v22   ;;  %v92_v24 = vpop.permute.xlu2 %91  }
  0x7e   :  { %22 = vst.msk [vmem:[#allocation0] sm:$0x1] %vm21_vm3, %v20_v20  }
  0x7f   :  { %28 = vst.msk [vmem:[#allocation0] sm:$0x1] %vm27_vm4, %v26_v23  }
  0x80   :  { %34 = vst.msk [vmem:[#allocation0] sm:$0x1] %vm33_vm5, %v32_v16  }
  0x81   :  { %40 = vst.msk [vmem:[#allocation0] sm:$0x1] %vm39_vm6, %v38_v17  }
  0x84   :  { %v44_v25 = vpop.permute.xlu0 %43   ;;  %v50_v26 = vpop.permute.xlu1 %49  }
  0x85   :  { %46 = vst.msk [vmem:[#allocation0] sm:$0x1] %vm45_vm7, %v44_v25  }
  0x86   :  { %52 = vst.msk [vmem:[#allocation0] sm:$0x1] %vm51_vm8, %v50_v26  }
  0x87   :  { %58 = vst.msk [vmem:[#allocation0] sm:$0x1] %vm57_vm9, %v56_v18  }
  0x8c   :  { %v62_v27 = vpop.permute.xlu0 %61   ;;  %v68_v28 = vpop.permute.xlu1 %67  }
  0x8d   :  { %64 = vst.msk [vmem:[#allocation0] sm:$0x1] %vm63_vm10, %v62_v27  }
  0x8e   :  { %70 = vst.msk [vmem:[#allocation0] sm:$0x1] %vm69_vm11, %v68_v28  }
  0x8f   :  { %76 = vst.msk [vmem:[#allocation0] sm:$0x1] %vm75_vm12, %v74_v21  }
  0x94   :  { %v80_v29 = vpop.permute.xlu0 %79   ;;  %v86_v30 = vpop.permute.xlu1 %85  }
  0x95   :  { %82 = vst.msk [vmem:[#allocation0] sm:$0x1] %vm81_vm13, %v80_v29  }
  0x96   :  { %88 = vst.msk [vmem:[#allocation0] sm:$0x1] %vm87_vm14, %v86_v30  }
  0x97   :  { %94 = vst.msk [vmem:[#allocation0] sm:$0x1] %vm93_vm15, %v92_v24  }
  0x9e   :  { %v97_v31 = vld [vmem:[#allocation0] sm:$0x1] }
  0x9f   :  { %100 = vst [vmem:[%s208_s1] sm:$0x1] %v97_v31 }

// kernel: conv_block.1
= control target key start
LH: loop header
LB: loop body
LE: loop exit
PB: predicated region body
PF: predicated region fallthrough
CT: control target
= control target key end

     0   :  { %vm43_vm0 = vcmask 588800   ;;  %s711_s1 = inlined_call_operand.vmem [shape: f32[3,72,128], index: 1, kind: input, shape index: {}]   ;;  %s712_s0 = inlined_call_operand.vmem [shape: f32[2,18,72], index: 0, kind: input, shape index: {}]   ;;  %s713_s2 = inlined_call_operand.vmem [shape: f32[128,128], index: 2, kind: input, shape index: {}]   ;;  %s714_s3 = inlined_call_operand.vmem [shape: f32[1,128], index: 3, kind: input, shape index: {}]   ;;  %s715_s4 = inlined_call_operand.vmem [shape: f32[1,128], index: 4, kind: input, shape index: {}]   ;;  %s716_s5 = inlined_call_operand.vmem [shape: f32[32,128], index: 5, kind: output, shape index: {}]  }
   0x1   :  { %v406_v0 = vld [vmem:[%s711_s1 + $0x88] sm:$0xff]  ;;  %v490_v1 = vld [vmem:[%s711_s1 + $0xd0] sm:$0xff]  ;;  %v495_v2 = vld [vmem:[%s711_s1 + $0x40] sm:$0xff] }
   0x2   :  { %57 = vmatpush.msra.mxu0 %v406_v0  ;;  %127 = vmatpush.msra.mxu2 %v490_v1  ;;  %v405_v3 = vld [vmem:[%s711_s1 + $0x80] sm:$0xff]  ;;  %v504_v4 = vld [vmem:[%s711_s1 + $0xc8] sm:$0xff]  ;;  %v509_v5 = vld [vmem:[%s711_s1 + $0x38] sm:$0xff] }
   0x3   :  { %86 = vmatpush.msra.mxu1 %v495_v2  ;;  %v404_v6 = vld [vmem:[%s711_s1 + $0x78] sm:$0xff]  ;;  %v518_v7 = vld [vmem:[%s711_s1 + $0xc0] sm:$0xff]  ;;  %183 = vmatpush.msra.mxu3 %v406_v0  ;;  %v524_v8 = vld [vmem:[%s711_s1 + $0x30] sm:$0xff] }
   0x4   :  { %58 = vmatpush.msra.mxu0 %v405_v3  ;;  %128 = vmatpush.msra.mxu2 %v504_v4  ;;  %v403_v9 = vld [vmem:[%s711_s1 + $0x70] sm:$0xff]  ;;  %v533_v10 = vld [vmem:[%s711_s1 + $0xb8] sm:$0xff]  ;;  %v27_v11 = vld [vmem:[%s711_s1 + $0x28] sm:$0xff] }
   0x5   :  { %87 = vmatpush.msra.mxu1 %v509_v5  ;;  %184 = vmatpush.msra.mxu3 %v405_v3  ;;  %v402_v12 = vld [vmem:[%s711_s1 + $0x68] sm:$0xff]  ;;  %v546_v13 = vld [vmem:[%s711_s1 + $0xb0] sm:$0xff]  ;;  %v26_v14 = vld [vmem:[%s711_s1 + $0x20] sm:$0xff] }
   0x6   :  { %59 = vmatpush.msra.mxu0 %v404_v6  ;;  %129 = vmatpush.msra.mxu2 %v518_v7  ;;  %v401_v15 = vld [vmem:[%s711_s1 + $0x60] sm:$0xff]  ;;  %v414_v16 = vld [vmem:[%s711_s1 + $0xa8] sm:$0xff]  ;;  %v25_v17 = vld [vmem:[%s711_s1 + $0x18] sm:$0xff] }
   0x7   :  { %88 = vmatpush.msra.mxu1 %v524_v8  ;;  %185 = vmatpush.msra.mxu3 %v404_v6  ;;  %v400_v18 = vld [vmem:[%s711_s1 + $0x58] sm:$0xff]  ;;  %v413_v19 = vld [vmem:[%s711_s1 + $0xa0] sm:$0xff]  ;;  %v24_v20 = vld [vmem:[%s711_s1 + $0x10] sm:$0xff] }
   0x8   :  { %60 = vmatpush.msra.mxu0 %v403_v9  ;;  %130 = vmatpush.msra.mxu2 %v533_v10  ;;  %v399_v21 = vld [vmem:[%s711_s1 + $0x50] sm:$0xff]  ;;  %v412_v22 = vld [vmem:[%s711_s1 + $0x98] sm:$0xff]  ;;  %v23_v23 = vld [vmem:[%s711_s1 + $0x8] sm:$0xff] }
   0x9   :  { %89 = vmatpush.msra.mxu1 %v27_v11  ;;  %186 = vmatpush.msra.mxu3 %v403_v9  ;;  %v398_v24 = vld [vmem:[%s711_s1 + $0x48] sm:$0xff]  ;;  %v411_v25 = vld [vmem:[%s711_s1 + $0x90] sm:$0xff]  ;;  %v22_v26 = vld [vmem:[%s711_s1] sm:$0xff] }
   0xa   :  { %61 = vmatpush.msra.mxu0 %v402_v12  ;;  %131 = vmatpush.msra.mxu2 %v546_v13  ;;  %v102_v27 = vld [vmem:[%s712_s0 + $0x2] sm:$0xff]  ;;  %v424_v30 = vld [vmem:[%s712_s0 + $0x19] sm:$0xff]  ;;  %v103_v31 = vld [vmem:[%s712_s0 + $0xa] sm:$0xff] }
   0xb   :  { %90 = vmatpush.msra.mxu1 %v26_v14  ;;  %187 = vmatpush.msra.mxu3 %v402_v12  ;;  %v20_v28 = vld [vmem:[%s712_s0] sm:$0xff]  ;;  %v21_v32 = vld [vmem:[%s712_s0 + $0x8] sm:$0xff]  ;;  %v422_v35 = vld [vmem:[%s712_s0 + $0x18] sm:$0xff] }
   0xc   :  { %62 = vmatpush.msra.mxu0 %v401_v15  ;;  %132 = vmatpush.msra.mxu2 %v414_v16  ;;  %v31_v29 = vld [vmem:[%s712_s0 + $0x1] sm:$0xff]  ;;  %v32_v33 = vld [vmem:[%s712_s0 + $0x9] sm:$0xff]  ;;  %v313_v39 = vld [vmem:[%s713_s2 + $0x78] sm:$0xff] }
   0xd   :  { %91 = vmatpush.msra.mxu1 %v25_v17  ;;  %188 = vmatpush.msra.mxu3 %v401_v15  ;;  %v425_v34 = vld [vmem:[%s712_s0 + $0x21] sm:$0xff]  ;;  %v312_v40 = vld [vmem:[%s713_s2 + $0x70] sm:$0xff]  ;;  %v309_v43 = vld [vmem:[%s713_s2 + $0x58] sm:$0xff] }
   0xe   :  { %63 = vmatpush.msra.mxu0 %v400_v18  ;;  %133 = vmatpush.msra.mxu2 %v413_v19  ;;  %v439_v36 = vld [vmem:[%s712_s0 + $0x1a] sm:$0xff]  ;;  %v440_v38 = vld [vmem:[%s712_s0 + $0x22] sm:$0xff]  ;;  %v308_v44 = vld [vmem:[%s713_s2 + $0x50] sm:$0xff] }
   0xf   :  { %92 = vmatpush.msra.mxu1 %v24_v20  ;;  %189 = vmatpush.msra.mxu3 %v400_v18  ;;  %v423_v37 = vld [vmem:[%s712_s0 + $0x20] sm:$0xff]  ;;  %v311_v41 = vld [vmem:[%s713_s2 + $0x68] sm:$0xff]  ;;  %v305_v47 = vld [vmem:[%s713_s2 + $0x38] sm:$0xff] }
  0x10   :  { %64 = vmatpush.msra.mxu0 %v399_v21  ;;  %134 = vmatpush.msra.mxu2 %v412_v22  ;;  %v310_v42 = vld [vmem:[%s713_s2 + $0x60] sm:$0xff]  ;;  %v307_v45 = vld [vmem:[%s713_s2 + $0x48] sm:$0xff]  ;;  %v304_v48 = vld [vmem:[%s713_s2 + $0x30] sm:$0xff] }
  0x11   :  { %93 = vmatpush.msra.mxu1 %v23_v23  ;;  %190 = vmatpush.msra.mxu3 %v399_v21  ;;  %v306_v46 = vld [vmem:[%s713_s2 + $0x40] sm:$0xff]  ;;  %v303_v49 = vld [vmem:[%s713_s2 + $0x28] sm:$0xff]  ;;  %v301_v53 = vld [vmem:[%s713_s2 + $0x18] sm:$0xff] }
  0x12   :  { %65 = vmatpush.msra.mxu0 %v398_v24  ;;  %135 = vmatpush.msra.mxu2 %v411_v25  ;;  %v302_v51 = vld [vmem:[%s713_s2 + $0x20] sm:$0xff]  ;;  %v300_v54 = vld [vmem:[%s713_s2 + $0x10] sm:$0xff]  ;;  %v299_v55 = vld [vmem:[%s713_s2 + $0x8] sm:$0xff] }
  0x13   :  { %94 = vmatpush.msra.mxu1 %v22_v26  ;;  %420 = vmatmul.msk.f32.vlgmr.msra.gmra.mxu2 %vm43_vm0, %v102_v27  ;;  %v298_v57 = vld [vmem:[%s713_s2] sm:$0xff] }
  0x14   :  { %212 = vmatpush.msrb.mxu0 %v495_v2  ;;  %409 = vmatmul.msk.f32.vlgmr.msra.gmra.mxu1 %vm43_vm0, %v20_v28 }
  0x15   :  { %407 = vmatmul.msk.f32.vlgmr.msra.gmra.mxu0 %vm43_vm0, %v31_v29  ;;  %252 = vmatpush.msrb.mxu1 %v490_v1 }
  0x16   :  { %213 = vmatpush.msrb.mxu0 %v509_v5  ;;  %191 = vmatpush.msra.mxu3 %v398_v24 }
  0x17   :  { %253 = vmatpush.msrb.mxu1 %v504_v4  ;;  %435 = vmatmul.msk.f32.vlgmr.msra.gmra.mxu3 %vm43_vm0, %v424_v30 }
  0x18   :  { %214 = vmatpush.msrb.mxu0 %v524_v8  ;;  %314 = vmatpush.msrb.mxu2 %v313_v39 }
  0x19   :  { %254 = vmatpush.msrb.mxu1 %v518_v7  ;;  %334 = vmatpush.msrb.mxu3 %v313_v39 }
  0x1a   :  { %215 = vmatpush.msrb.mxu0 %v27_v11  ;;  %315 = vmatpush.msrb.mxu2 %v312_v40 }
  0x1b   :  { %421 = vmatmul.msk.f32.gmra.mxu2 %vm43_vm0, %v103_v31  ;;  %255 = vmatpush.msrb.mxu1 %v533_v10 }
  0x1c   :  { %216 = vmatpush.msrb.mxu0 %v26_v14  ;;  %410 = vmatmul.msk.f32.gmra.mxu1 %vm43_vm0, %v21_v32 }
  0x1d   :  { %408 = vmatmul.msk.f32.gmra.mxu0 %vm43_vm0, %v32_v33  ;;  %256 = vmatpush.msrb.mxu1 %v546_v13 }
  0x1e   :  { %217 = vmatpush.msrb.mxu0 %v25_v17  ;;  %335 = vmatpush.msrb.mxu3 %v312_v40 }
  0x1f   :  { %257 = vmatpush.msrb.mxu1 %v414_v16  ;;  %436 = vmatmul.msk.f32.gmra.mxu3 %vm43_vm0, %v425_v34 }
  0x20   :  { %218 = vmatpush.msrb.mxu0 %v24_v20  ;;  %316 = vmatpush.msrb.mxu2 %v311_v41 }
  0x21   :  { %258 = vmatpush.msrb.mxu1 %v413_v19  ;;  %336 = vmatpush.msrb.mxu3 %v311_v41 }
  0x22   :  { %219 = vmatpush.msrb.mxu0 %v23_v23  ;;  %317 = vmatpush.msrb.mxu2 %v310_v42 }
  0x23   :  { %259 = vmatpush.msrb.mxu1 %v412_v22  ;;  %337 = vmatpush.msrb.mxu3 %v310_v42 }
  0x24   :  { %220 = vmatpush.msrb.mxu0 %v22_v26  ;;  %318 = vmatpush.msrb.mxu2 %v309_v43 }
  0x25   :  { %437 = vmatmul.msk.f32.vlgmr.msrb.gmra.mxu0 %vm43_vm0, %v422_v35  ;;  %260 = vmatpush.msrb.mxu1 %v411_v25 }
  0x26   :  { %450 = vmatmul.msk.f32.vlgmr.msrb.gmra.mxu1 %vm43_vm0, %v439_v36  ;;  %338 = vmatpush.msrb.mxu3 %v309_v43 }
  0x27   :  { %319 = vmatpush.msrb.mxu2 %v308_v44 }
  0x28   :  { %339 = vmatpush.msrb.mxu3 %v308_v44 }
  0x29   :  { %320 = vmatpush.msrb.mxu2 %v307_v45 }
  0x2a   :  { %340 = vmatpush.msrb.mxu3 %v307_v45 }
  0x2b   :  { %321 = vmatpush.msrb.mxu2 %v306_v46 }
  0x2c   :  { %341 = vmatpush.msrb.mxu3 %v306_v46  ;;  %v369_v46 = vld [vmem:[%s714_s3] sm:$0x1] }
  0x2d   :  { %438 = vmatmul.msk.f32.gmra.mxu0 %vm43_vm0, %v423_v37  ;;  %322 = vmatpush.msrb.mxu2 %v305_v47 }
  0x2e   :  { %451 = vmatmul.msk.f32.gmra.mxu1 %vm43_vm0, %v440_v38  ;;  %342 = vmatpush.msrb.mxu3 %v305_v47 }
  0x2f   :  { %323 = vmatpush.msrb.mxu2 %v304_v48 }
  0x30   :  { %343 = vmatpush.msrb.mxu3 %v304_v48 }
  0x31   :  { %324 = vmatpush.msrb.mxu2 %v303_v49 }
  0x32   :  { %344 = vmatpush.msrb.mxu3 %v303_v49  ;;  %v371_v49 = vld [vmem:[%s715_s4] sm:$0x1] }
  0x33   :  { %325 = vmatpush.msrb.mxu2 %v302_v51 }
  0x34   :  { %345 = vmatpush.msrb.mxu3 %v302_v51 }
  0x35   :  { %326 = vmatpush.msrb.mxu2 %v301_v53 }
  0x36   :  { %346 = vmatpush.msrb.mxu3 %v301_v53 }
  0x37   :  { %327 = vmatpush.msrb.mxu2 %v300_v54 }
  0x38   :  { %347 = vmatpush.msrb.mxu3 %v300_v54 }
  0x39   :  { %328 = vmatpush.msrb.mxu2 %v299_v55 }
  0x3a   :  { %348 = vmatpush.msrb.mxu3 %v299_v55 }
  0x3b   :  { %329 = vmatpush.msrb.mxu2 %v298_v57 }
  0x3c   :  { %349 = vmatpush.msrb.mxu3 %v298_v57 }
  0x91   :  { %v96_v50 = vpop.f32.mrf.mxu1 }
  0x92   :  { %v67_v52 = vpop.f32.mrf.mxu0 }
  0x93   :  { %v97_v2 = vadd.f32 %v96_v50, %v67_v52 }
  0x96   :  { %v137_v56 = vpop.f32.mrf.mxu2 }
  0x97   :  { %v143_v4 = vadd.f32 %v137_v56, %v97_v2 }
  0x99   :  { %v99_v59 = vpop.f32.mrf.mxu1  ;;  %v285_v12 = vmul.f32 %v143_v4, %v143_v4 }
  0x9a   :  { %v70_v58 = vpop.f32.mrf.mxu0  ;;  %v193_v60 = vpop.f32.mrf.mxu3 }
  0x9b   :  { %v100_v63 = vadd.f32 %v99_v59, %v70_v58 }
  0x9e   :  { %v140_v61 = vpop.f32.mrf.mxu2 }
  0x9f   :  { %v144_v3 = vadd.f32 %v140_v61, %v100_v63 }
  0xa1   :  { %v286_v7 = vmul.f32 %v144_v3, %v144_v3  ;;  %v276_v11 = vadd.f32 %v144_v3, %v143_v4 }
  0xa2   :  { %v222_v62 = vpop.f32.mrf.mxu0  ;;  %v196_v6 = vpop.f32.mrf.mxu3 }
  0xa3   :  { %v223_v0 = vadd.f32 %v222_v62, %v193_v60  ;;  %v262_v1 = vpop.f32.mrf.mxu1  ;;  %v289_v16 = vadd.f32 %v286_v7, %v285_v12 }
  0xa5   :  { %v268_v5 = vadd.f32 %v262_v1, %v223_v0 }
  0xa7   :  { %v287_v13 = vmul.f32 %v268_v5, %v268_v5  ;;  %v277_v15 = vadd.f32 %v276_v11, %v268_v5 }
  0xa9   :  { %v290_v19 = vadd.f32 %v289_v16, %v287_v13 }
  0xaa   :  { %v225_v8 = vpop.f32.mrf.mxu0 }
  0xab   :  { %v226_v9 = vadd.f32 %v225_v8, %v196_v6  ;;  %v265_v10 = vpop.f32.mrf.mxu1 }
  0xad   :  { %v269_v14 = vadd.f32 %v265_v10, %v226_v9 }
  0xaf   :  { %v278_v17 = vadd.f32 %v277_v15, %v269_v14  ;;  %v288_v18 = vmul.f32 %v269_v14, %v269_v14 }
  0xb1   :  { %v279_v20 = vrot.slane %v278_v17, 4  ;;  %v291_v21 = vadd.f32 %v290_v19, %v288_v18 }
  0xb3   :  { %v280_v22 = vadd.f32 %v279_v20, %v278_v17  ;;  %v292_v23 = vrot.slane %v291_v21, 4 }
  0xb5   :  { %v281_v24 = vrot.slane %v280_v22, 2  ;;  %v293_v25 = vadd.f32 %v292_v23, %v291_v21 }
  0xb7   :  { %v282_v26 = vadd.f32 %v281_v24, %v280_v22  ;;  %v294_v27 = vrot.slane %v293_v25, 2 }
  0xb9   :  { %v283_v28 = vrot.slane %v282_v26, 1  ;;  %v295_v29 = vadd.f32 %v294_v27, %v293_v25 }
  0xbb   :  { %v284_v30 = vadd.f32 %v283_v28, %v282_v26  ;;  %v296_v31 = vrot.slane %v295_v29, 1 }
  0xbd   :  { %330 = vmatmul.f32.vlgmr.msrb.gmra.mxu2 %v284_v30  ;;  %v297_v32 = vadd.f32 %v296_v31, %v295_v29 }
  0xbf   :  { %350 = vmatmul.f32.vlgmr.msrb.gmra.mxu3 %v297_v32 }
 0x140   :  { %v331_v33 = vpop.f32.mrf.mxu2 }
 0x141   :  { %v354_v34 = vmul.f32 0.001953125, %v331_v33 }
 0x142   :  { %v351_v35 = vpop.f32.mrf.mxu3 }
 0x143   :  { %v356_v36 = vmul.f32 %v354_v34, %v354_v34  ;;  %v355_v37 = vmul.f32 0.001953125, %v351_v35 }
 0x145   :  { %v357_v38 = vsub.f32 %v355_v37, %v356_v36 }
 0x147   :  { %v358_v39 = vadd.f32 1e-05, %v357_v38 }
 0x149   :  { %452 = vrsqrt.f32 %v358_v39  ;;  %vm365_vm2 = vweird.f32 %v358_v39 }
 0x14f   :  { %v453_v40 = vpop.eup %452 }
 0x150   :  { %v360_v41 = vmul.f32 %v453_v40, %v358_v39  ;;  %vm366_vm1 = vweird.f32 %v453_v40 }
 0x151   :  { %vm367_vm3 = vmor %vm365_vm2, %vm366_vm1 }
 0x152   :  { %v361_v42 = vmul.f32 %v453_v40, %v360_v41 }
 0x154   :  { %v362_v43 = vmul.f32 0.5, %v361_v42 }
 0x156   :  { %v363_v44 = vsub.f32 1.5, %v362_v43 }
 0x158   :  { %v364_v45 = vmul.f32 %v453_v40, %v363_v44 }
 0x15a   :  { %v368_v47 = vsel %vm367_vm3, %v453_v40, %v364_v45 }
 0x15b   :  { %v370_v48 = vmul.f32 %v369_v46, %v368_v47 }
 0x15d   :  { %v372_v50 = vmul.f32 %v370_v48, %v354_v34  ;;  %v374_v51 = vperm.slane %v370_v48, 0 }
 0x15f   :  { %v373_v52 = vsub.f32 %v371_v49, %v372_v50  ;;  %v375_v53 = vmul.f32 %v374_v51, %v143_v4  ;;  %v376_v54 = vmul.f32 %v374_v51, %v144_v3  ;;  %v377_v55 = vmul.f32 %v374_v51, %v268_v5 }
 0x160   :  { %v378_v56 = vmul.f32 %v374_v51, %v269_v14 }
 0x161   :  { %v380_v57 = vperm.slane %v373_v52, 0 }
 0x163   :  { %v382_v58 = vadd.f32 %v380_v57, %v375_v53  ;;  %v383_v59 = vadd.f32 %v380_v57, %v376_v54  ;;  %v384_v60 = vadd.f32 %v380_v57, %v377_v55  ;;  %v385_v61 = vadd.f32 %v380_v57, %v378_v56 }
 0x165   :  { %v386_v62 = vmax.f32 %v382_v58, 0.0  ;;  %v387_v63 = vmax.f32 %v383_v59, 0.0  ;;  %v388_v0 = vmax.f32 %v384_v60, 0.0  ;;  %v389_v1 = vmax.f32 %v385_v61, 0.0 }
 0x167   :  { %390 = vst [vmem:[%s716_s5] sm:$0xff] %v386_v62 }
 0x168   :  { %391 = vst [vmem:[%s716_s5 + $0x8] sm:$0xff] %v387_v63 }
 0x169   :  { %392 = vst [vmem:[%s716_s5 + $0x10] sm:$0xff] %v388_v0 }
 0x16a   :  { %393 = vst [vmem:[%s716_s5 + $0x18] sm:$0xff] %v389_v1 }

</bundles_post_ra>
